<compile_context>
chip_gen: v6e
topology: v6e:2x2x1
jax: 0.10.0
libtpu: 0.0.40
codegen_flags: <defaults>
</compile_context>

<pallas_src>
import functools

import jax
import jax.numpy as jnp
from jax.experimental import pallas as pl
from jax.experimental.pallas import tpu as pltpu


def _round_up(x, m):
    return ((x + m - 1) // m) * m


def embeddings_kernel(tok_ids_ref, pos_ids_ref,          # scalar-prefetch (SMEM)
                      tok_emb_hbm, pos_emb_hbm,          # tables, HBM (pl.ANY)
                      gamma_ref, beta_ref, w_ref, b_ref, # resident VMEM blocks
                      out_ref,                           # (tile_n, H_attn) VMEM
                      tok_buf, pos_buf, sems):           # scratch
    tile_n = out_ref.shape[0]
    base = pl.program_id(0) * tile_n

    # ---- DMA gather: one row copy per id, all issued before any wait ----------
    @pl.loop(0, tile_n)
    def _(r):
        tok_row = tok_ids_ref[base + r]
        pos_row = pos_ids_ref[base + r]
        pltpu.make_async_copy(tok_emb_hbm.at[pl.ds(tok_row, 1)],
                              tok_buf.at[pl.ds(r, 1)], sems.at[0]).start()
        pltpu.make_async_copy(pos_emb_hbm.at[pl.ds(pos_row, 1)],
                              pos_buf.at[pl.ds(r, 1)], sems.at[1]).start()

    # Wait for all rows: each wait decrements by exactly one row's worth, and we
    # issue as many waits as starts per semaphore.
    @pl.loop(0, tile_n)
    def _(r):
        pltpu.make_async_copy(tok_emb_hbm.at[pl.ds(0, 1)],
                              tok_buf.at[pl.ds(0, 1)], sems.at[0]).wait()
        pltpu.make_async_copy(pos_emb_hbm.at[pl.ds(0, 1)],
                              pos_buf.at[pl.ds(0, 1)], sems.at[1]).wait()

    # ---- LayerNorm (f32, PyTorch semantics: biased variance, eps=1e-5) --------
    x = tok_buf[...] + pos_buf[...]                       # (tile_n, H) f32
    mean = jnp.mean(x, axis=-1, keepdims=True)
    xc = x - mean
    var = jnp.mean(xc * xc, axis=-1, keepdims=True)
    xn = xc * jax.lax.rsqrt(var + 1e-5)
    xn = xn * gamma_ref[...] + beta_ref[...]              # gamma/beta: (1, H)

    # ---- Projection: y = xn @ W^T + b  (bf16 MXU operands, f32 accumulation) --
    y = jax.lax.dot_general(
        xn.astype(jnp.bfloat16), w_ref[...],              # w_ref already bf16, (H_attn, H)
        dimension_numbers=(((1,), (1,)), ((), ())),
        preferred_element_type=jnp.float32)               # (tile_n, H_attn)
    out_ref[...] = (y + b_ref[...]).astype(out_ref.dtype)


def embeddings_forward(tok_ids, pos_ids, params, *, tile_n=256):
    """tok_ids, pos_ids: (B, S) int32. Returns (B, S, H_attn) float32."""
    B, S = tok_ids.shape
    N = B * S

    tok_emb = params["tok_emb"]       # (V, H) f32, stays in HBM
    pos_emb = params["pos_emb"]       # (L, H) f32, stays in HBM
    gamma = params["gamma"]           # (H,)
    beta = params["beta"]             # (H,)
    w = params["w_proj"]              # (H_attn, H)  torch layout (no transpose)
    b = params["b_proj"]              # (H_attn,)

    V, H = tok_emb.shape
    L = pos_emb.shape[0]
    H_attn = w.shape[0]

    # Tile over rows: multiple of 8 sublanes, no larger than the (padded) N.
    tile_n = min(int(tile_n), _round_up(N, 8))
    tile_n = _round_up(tile_n, 8)
    n_pad = _round_up(N, tile_n)

    # Ids live in SMEM (scalar prefetch); clamp so the DMA gather never goes OOB.
    tok_flat = jnp.clip(tok_ids.reshape(-1), 0, V - 1).astype(jnp.int32)
    pos_flat = jnp.clip(pos_ids.reshape(-1), 0, L - 1).astype(jnp.int32)
    if n_pad != N:
        pad = n_pad - N
        tok_flat = jnp.concatenate([tok_flat, jnp.zeros((pad,), jnp.int32)])
        pos_flat = jnp.concatenate([pos_flat, jnp.zeros((pad,), jnp.int32)])

    gamma2 = gamma.reshape(1, H)
    beta2 = beta.reshape(1, H)
    b2 = b.reshape(1, H_attn)
    # bf16 copy of the projection weight for the MXU (in production cache this
    # at init instead of casting per call).
    w_bf16 = w.astype(jnp.bfloat16)

    resident = lambda i, tok, pos: (0, 0)   # index_maps see the prefetch refs too

    out = pl.pallas_call(
        embeddings_kernel,
        out_shape=jax.ShapeDtypeStruct((n_pad, H_attn), jnp.float32),
        grid_spec=pltpu.PrefetchScalarGridSpec(
            num_scalar_prefetch=2,
            grid=(n_pad // tile_n,),
            in_specs=[
                pl.BlockSpec(memory_space=pl.ANY),          # tok_emb (HBM)
                pl.BlockSpec(memory_space=pl.ANY),          # pos_emb (HBM)
                pl.BlockSpec((1, H), resident),             # gamma
                pl.BlockSpec((1, H), resident),             # beta
                pl.BlockSpec((H_attn, H), resident),        # W (bf16, resident)
                pl.BlockSpec((1, H_attn), resident),        # b
            ],
            out_specs=pl.BlockSpec((tile_n, H_attn), lambda i, tok, pos: (i, 0)),
            scratch_shapes=[
                pltpu.VMEM((tile_n, H), jnp.float32),       # gathered token rows
                pltpu.VMEM((tile_n, H), jnp.float32),       # gathered pos rows
                pltpu.SemaphoreType.DMA((2,)),
            ]),
        compiler_params=pltpu.CompilerParams(
            dimension_semantics=("parallel",)),             # v7x: 2 TCs split rows
    )(tok_flat, pos_flat, tok_emb, pos_emb, gamma2, beta2, w_bf16, b2)

    return out[:N].reshape(B, S, H_attn)


def init_params(key, vocab_size, max_len, h_size, h_attn_size):
    k1, k2, k3, k4, k5, k6 = jax.random.split(key, 6)
    tok_emb = jax.random.normal(k1, (vocab_size, h_size), jnp.float32) * 0.02
    tok_emb = tok_emb.at[0].set(0.0)   # padding_idx=0 row is zeros
    pos_emb = jax.random.normal(k2, (max_len, h_size), jnp.float32) * 0.02
    gamma = 1.0 + 0.1 * jax.random.normal(k5, (h_size,), jnp.float32)
    beta = 0.1 * jax.random.normal(k6, (h_size,), jnp.float32)
    w_proj = jax.random.normal(k3, (h_attn_size, h_size), jnp.float32) * 0.02
    b_proj = jax.random.normal(k4, (h_attn_size,), jnp.float32) * 0.02
    return dict(tok_emb=tok_emb, pos_emb=pos_emb, gamma=gamma, beta=beta,
                w_proj=w_proj, b_proj=b_proj)


def reference_forward(tok_ids, pos_ids, params):
    rep = params["tok_emb"][tok_ids]               # (B, S, H)
    pe = params["pos_emb"][pos_ids]                # (B, S, H)
    x = rep + pe
    mean = jnp.mean(x, axis=-1, keepdims=True)
    var = jnp.mean((x - mean) ** 2, axis=-1, keepdims=True)
    xn = (x - mean) / jnp.sqrt(var + 1e-5)
    xn = xn * params["gamma"] + params["beta"]
    return xn @ params["w_proj"].T + params["b_proj"]


if __name__ == "__main__":
    # Small, lane-dense shapes consistent with the module's forward.
    B, S = 2, 8
    vocab_size, max_len = 512, 64
    h_size, h_attn_size = 128, 128

    key = jax.random.PRNGKey(0)
    kp, kt = jax.random.split(key)
    params = init_params(kp, vocab_size, max_len, h_size, h_attn_size)

    tok_ids = jax.random.randint(kt, (B, S), 0, vocab_size, dtype=jnp.int32)
    pos_ids = jnp.tile(jnp.arange(S, dtype=jnp.int32)[None, :], (B, 1))

    out = embeddings_forward(tok_ids, pos_ids, params)
    out = jax.block_until_ready(out)

    ref = reference_forward(tok_ids, pos_ids, params)
    assert out.shape == (B, S, h_attn_size)
    max_err = float(jnp.max(jnp.abs(out - ref)))
    # bf16 MXU operands (f32 accumulation) vs the pure-f32 reference.
    assert jnp.allclose(out, ref, atol=3e-2, rtol=3e-2), f"max abs err {max_err}"

    # TODO(synk): ELMo branch (use_elmo=1, allennlp Elmo + batch_to_ids) has no
    # Pallas equivalent and is omitted; only the use_elmo=0 path is implemented.
    print("KERNEL_OK")
</pallas_src>

<mosaic_0001>
module attributes {stable_mosaic.version = 11 : i64} {
  func.func @embeddings_kernel(%arg0: i32, %arg1: memref<16xi32, #tpu.memory_space<smem>>, %arg2: memref<16xi32, #tpu.memory_space<smem>>, %arg3: memref<512x128xf32, #tpu.memory_space<any>>, %arg4: memref<64x128xf32, #tpu.memory_space<any>>, %arg5: memref<1x128xf32, #tpu.memory_space<vmem>>, %arg6: memref<1x128xf32, #tpu.memory_space<vmem>>, %arg7: memref<128x128xbf16, #tpu.memory_space<vmem>>, %arg8: memref<1x128xf32, #tpu.memory_space<vmem>>, %arg9: memref<16x128xf32, #tpu.memory_space<vmem>>, %arg10: memref<16x128xf32, #tpu.memory_space<vmem>>, %arg11: memref<16x128xf32, #tpu.memory_space<vmem>>, %arg12: memref<2x!tpu.dma_semaphore, #tpu.memory_space<semaphore_mem>>) attributes {dimension_semantics = [#tpu.dimension_semantics<parallel>], iteration_bounds = array<i64: 1>, scalar_prefetch = 2 : i64, scratch_operands = 3 : i64, tpu.core_type = #tpu.core_type<tc>, window_params = [{}, {}, {pipeline_mode = #tpu.pipeline_mode<synchronous>, transform_indices = @transform_2, window_bounds = array<i64: 1, 128>}, {pipeline_mode = #tpu.pipeline_mode<synchronous>, transform_indices = @transform_3, window_bounds = array<i64: 1, 128>}, {pipeline_mode = #tpu.pipeline_mode<synchronous>, transform_indices = @transform_4, window_bounds = array<i64: 128, 128>}, {pipeline_mode = #tpu.pipeline_mode<synchronous>, transform_indices = @transform_5, window_bounds = array<i64: 1, 128>}, {transform_indices = @transform_6, window_bounds = array<i64: 16, 128>}]} {
    %c16_i32 = arith.constant 16 : i32
    %0 = arith.muli %arg0, %c16_i32 : i32
    %c0_i32 = arith.constant 0 : i32
    %c16_i32_0 = arith.constant 16 : i32
    %1 = arith.addi %c0_i32, %c16_i32_0 : i32
    %c1_i32 = arith.constant 1 : i32
    scf.for %arg13 = %c0_i32 to %1 step %c1_i32  : i32 {
      %c1_i32_23 = arith.constant 1 : i32
      %35 = arith.muli %arg13, %c1_i32_23 : i32
      %c0_i32_24 = arith.constant 0 : i32
      %36 = arith.addi %c0_i32_24, %35 : i32
      %37 = arith.addi %0, %36 : i32
      %38 = arith.index_cast %37 : i32 to index
      %39 = memref.load %arg1[%38] : memref<16xi32, #tpu.memory_space<smem>>
      %40 = arith.addi %0, %36 : i32
      %41 = arith.index_cast %40 : i32 to index
      %42 = memref.load %arg2[%41] : memref<16xi32, #tpu.memory_space<smem>>
      %c0_i32_25 = arith.constant 0 : i32
      %c0_i32_26 = arith.constant 0 : i32
      %43 = tpu.memref_slice %arg3[%39, %c0_i32_26] : memref<512x128xf32, #tpu.memory_space<any>> -> memref<1x128xf32, #tpu.memory_space<any>>
      %c0_i32_27 = arith.constant 0 : i32
      %44 = tpu.memref_slice %arg10[%36, %c0_i32_27] : memref<16x128xf32, #tpu.memory_space<vmem>> -> memref<1x128xf32, #tpu.memory_space<vmem>>
      %45 = tpu.memref_slice %arg12[%c0_i32_25] : memref<2x!tpu.dma_semaphore, #tpu.memory_space<semaphore_mem>> -> memref<1x!tpu.dma_semaphore, #tpu.memory_space<semaphore_mem>>
      %46 = tpu.memref_squeeze %45 : memref<1x!tpu.dma_semaphore, #tpu.memory_space<semaphore_mem>> -> memref<!tpu.dma_semaphore, #tpu.memory_space<semaphore_mem>>
      tpu.enqueue_dma source(%43 : memref<1x128xf32, #tpu.memory_space<any>>) target(%44 : memref<1x128xf32, #tpu.memory_space<vmem>>) target_semaphore(%46 : memref<!tpu.dma_semaphore, #tpu.memory_space<semaphore_mem>>)
      %c1_i32_28 = arith.constant 1 : i32
      %c0_i32_29 = arith.constant 0 : i32
      %47 = tpu.memref_slice %arg4[%42, %c0_i32_29] : memref<64x128xf32, #tpu.memory_space<any>> -> memref<1x128xf32, #tpu.memory_space<any>>
      %c0_i32_30 = arith.constant 0 : i32
      %48 = tpu.memref_slice %arg11[%36, %c0_i32_30] : memref<16x128xf32, #tpu.memory_space<vmem>> -> memref<1x128xf32, #tpu.memory_space<vmem>>
      %49 = tpu.memref_slice %arg12[%c1_i32_28] : memref<2x!tpu.dma_semaphore, #tpu.memory_space<semaphore_mem>> -> memref<1x!tpu.dma_semaphore, #tpu.memory_space<semaphore_mem>>
      %50 = tpu.memref_squeeze %49 : memref<1x!tpu.dma_semaphore, #tpu.memory_space<semaphore_mem>> -> memref<!tpu.dma_semaphore, #tpu.memory_space<semaphore_mem>>
      tpu.enqueue_dma source(%47 : memref<1x128xf32, #tpu.memory_space<any>>) target(%48 : memref<1x128xf32, #tpu.memory_space<vmem>>) target_semaphore(%50 : memref<!tpu.dma_semaphore, #tpu.memory_space<semaphore_mem>>)
    }
    %c16_i32_1 = arith.constant 16 : i32
    %c0_i32_2 = arith.constant 0 : i32
    %c16_i32_3 = arith.constant 16 : i32
    %2 = arith.addi %c0_i32_2, %c16_i32_3 : i32
    %c1_i32_4 = arith.constant 1 : i32
    scf.for %arg13 = %c0_i32_2 to %2 step %c1_i32_4  : i32 {
      %c0_i32_23 = arith.constant 0 : i32
      %c0_i32_24 = arith.constant 0 : i32
      %c0_i32_25 = arith.constant 0 : i32
      %35 = tpu.memref_slice %arg3[%c0_i32_24, %c0_i32_25] : memref<512x128xf32, #tpu.memory_space<any>> -> memref<1x128xf32, #tpu.memory_space<any>>
      %c0_i32_26 = arith.constant 0 : i32
      %c0_i32_27 = arith.constant 0 : i32
      %36 = tpu.memref_slice %arg10[%c0_i32_26, %c0_i32_27] : memref<16x128xf32, #tpu.memory_space<vmem>> -> memref<1x128xf32, #tpu.memory_space<vmem>>
      %37 = tpu.memref_slice %arg12[%c0_i32_23] : memref<2x!tpu.dma_semaphore, #tpu.memory_space<semaphore_mem>> -> memref<1x!tpu.dma_semaphore, #tpu.memory_space<semaphore_mem>>
      %38 = tpu.memref_squeeze %37 : memref<1x!tpu.dma_semaphore, #tpu.memory_space<semaphore_mem>> -> memref<!tpu.dma_semaphore, #tpu.memory_space<semaphore_mem>>
      tpu.wait_dma2 semaphore(%38 : memref<!tpu.dma_semaphore, #tpu.memory_space<semaphore_mem>>) src(%35 : memref<1x128xf32, #tpu.memory_space<any>>) dst(%36 : memref<1x128xf32, #tpu.memory_space<vmem>>)
      %c1_i32_28 = arith.constant 1 : i32
      %c0_i32_29 = arith.constant 0 : i32
      %c0_i32_30 = arith.constant 0 : i32
      %39 = tpu.memref_slice %arg4[%c0_i32_29, %c0_i32_30] : memref<64x128xf32, #tpu.memory_space<any>> -> memref<1x128xf32, #tpu.memory_space<any>>
      %c0_i32_31 = arith.constant 0 : i32
      %c0_i32_32 = arith.constant 0 : i32
      %40 = tpu.memref_slice %arg11[%c0_i32_31, %c0_i32_32] : memref<16x128xf32, #tpu.memory_space<vmem>> -> memref<1x128xf32, #tpu.memory_space<vmem>>
      %41 = tpu.memref_slice %arg12[%c1_i32_28] : memref<2x!tpu.dma_semaphore, #tpu.memory_space<semaphore_mem>> -> memref<1x!tpu.dma_semaphore, #tpu.memory_space<semaphore_mem>>
      %42 = tpu.memref_squeeze %41 : memref<1x!tpu.dma_semaphore, #tpu.memory_space<semaphore_mem>> -> memref<!tpu.dma_semaphore, #tpu.memory_space<semaphore_mem>>
      tpu.wait_dma2 semaphore(%42 : memref<!tpu.dma_semaphore, #tpu.memory_space<semaphore_mem>>) src(%39 : memref<1x128xf32, #tpu.memory_space<any>>) dst(%40 : memref<1x128xf32, #tpu.memory_space<vmem>>)
    }
    %c0 = arith.constant 0 : index
    %c0_5 = arith.constant 0 : index
    %3 = vector.load %arg10[%c0, %c0_5] : memref<16x128xf32, #tpu.memory_space<vmem>>, vector<16x128xf32>
    %c0_6 = arith.constant 0 : index
    %c0_7 = arith.constant 0 : index
    %4 = vector.load %arg11[%c0_6, %c0_7] : memref<16x128xf32, #tpu.memory_space<vmem>>, vector<16x128xf32>
    %5 = arith.addf %3, %4 : vector<16x128xf32>
    %cst = arith.constant dense<0.000000e+00> : vector<16xf32>
    %6 = vector.multi_reduction <add>, %5, %cst [1] : vector<16x128xf32> to vector<16xf32>
    %7 = vector.shape_cast %6 : vector<16xf32> to vector<16x1xf32>
    %cst_8 = arith.constant 1.280000e+02 : f32
    %8 = vector.broadcast %cst_8 : f32 to vector<16x1xf32>
    %9 = arith.divf %7, %8 : vector<16x1xf32>
    %10 = vector.broadcast %9 : vector<16x1xf32> to vector<16x128xf32>
    %11 = arith.subf %5, %10 : vector<16x128xf32>
    %12 = arith.mulf %11, %11 : vector<16x128xf32>
    %cst_9 = arith.constant dense<0.000000e+00> : vector<16xf32>
    %13 = vector.multi_reduction <add>, %12, %cst_9 [1] : vector<16x128xf32> to vector<16xf32>
    %14 = vector.shape_cast %13 : vector<16xf32> to vector<16x1xf32>
    %cst_10 = arith.constant 1.280000e+02 : f32
    %15 = vector.broadcast %cst_10 : f32 to vector<16x1xf32>
    %16 = arith.divf %14, %15 : vector<16x1xf32>
    %cst_11 = arith.constant 9.99999974E-6 : f32
    %17 = vector.broadcast %cst_11 : f32 to vector<16x1xf32>
    %18 = arith.addf %16, %17 : vector<16x1xf32>
    %19 = math.rsqrt %18 : vector<16x1xf32>
    %20 = vector.broadcast %19 : vector<16x1xf32> to vector<16x128xf32>
    %21 = arith.mulf %11, %20 : vector<16x128xf32>
    %c0_12 = arith.constant 0 : index
    %c0_13 = arith.constant 0 : index
    %22 = vector.load %arg5[%c0_12, %c0_13] : memref<1x128xf32, #tpu.memory_space<vmem>>, vector<1x128xf32>
    %23 = vector.broadcast %22 : vector<1x128xf32> to vector<16x128xf32>
    %24 = arith.mulf %21, %23 : vector<16x128xf32>
    %c0_14 = arith.constant 0 : index
    %c0_15 = arith.constant 0 : index
    %25 = vector.load %arg6[%c0_14, %c0_15] : memref<1x128xf32, #tpu.memory_space<vmem>>, vector<1x128xf32>
    %26 = vector.broadcast %25 : vector<1x128xf32> to vector<16x128xf32>
    %27 = arith.addf %24, %26 : vector<16x128xf32>
    %28 = arith.truncf %27 : vector<16x128xf32> to vector<16x128xbf16>
    %c0_16 = arith.constant 0 : index
    %c0_17 = arith.constant 0 : index
    %29 = vector.load %arg7[%c0_16, %c0_17] : memref<128x128xbf16, #tpu.memory_space<vmem>>, vector<128x128xbf16>
    %cst_18 = arith.constant dense<0.000000e+00> : vector<16x128xf32>
    %30 = tpu.matmul %28, %29, %cst_18 {dimension_numbers = #tpu.dot_dimension_numbers<[1], [1], [0], [0], [0, 0, 1, 0], [], []>} : vector<16x128xbf16>, vector<128x128xbf16>, vector<16x128xf32> -> vector<16x128xf32>
    %c0_19 = arith.constant 0 : index
    %c0_20 = arith.constant 0 : index
    %31 = vector.load %arg8[%c0_19, %c0_20] : memref<1x128xf32, #tpu.memory_space<vmem>>, vector<1x128xf32>
    %32 = vector.broadcast %31 : vector<1x128xf32> to vector<16x128xf32>
    %33 = arith.addf %30, %32 : vector<16x128xf32>
    %c0_21 = arith.constant 0 : index
    %c0_22 = arith.constant 0 : index
    %34 = vector.load %arg9[%c0_21, %c0_22] : memref<16x128xf32, #tpu.memory_space<vmem>>, vector<16x128xf32>
    tpu.vector_store %arg9[%c0_21, %c0_22], %33 {strides = array<i32>} : memref<16x128xf32, #tpu.memory_space<vmem>>, vector<16x128xf32>,
    return
  }
  func.func @transform_2(%arg0: i32, %arg1: memref<16xi32, #tpu.memory_space<smem>>, %arg2: memref<16xi32, #tpu.memory_space<smem>>) -> (i32, i32) {
    %c0_i32 = arith.constant 0 : i32
    %c0_i32_0 = arith.constant 0 : i32
    %c0_i32_1 = arith.constant 0 : i32
    return %c0_i32, %c0_i32_0 : i32, i32
  }
  func.func @transform_3(%arg0: i32, %arg1: memref<16xi32, #tpu.memory_space<smem>>, %arg2: memref<16xi32, #tpu.memory_space<smem>>) -> (i32, i32) {
    %c0_i32 = arith.constant 0 : i32
    %c0_i32_0 = arith.constant 0 : i32
    %c0_i32_1 = arith.constant 0 : i32
    return %c0_i32, %c0_i32_0 : i32, i32
  }
  func.func @transform_4(%arg0: i32, %arg1: memref<16xi32, #tpu.memory_space<smem>>, %arg2: memref<16xi32, #tpu.memory_space<smem>>) -> (i32, i32) {
    %c0_i32 = arith.constant 0 : i32
    %c0_i32_0 = arith.constant 0 : i32
    %c0_i32_1 = arith.constant 0 : i32
    return %c0_i32, %c0_i32_0 : i32, i32
  }
  func.func @transform_5(%arg0: i32, %arg1: memref<16xi32, #tpu.memory_space<smem>>, %arg2: memref<16xi32, #tpu.memory_space<smem>>) -> (i32, i32) {
    %c0_i32 = arith.constant 0 : i32
    %c0_i32_0 = arith.constant 0 : i32
    %c0_i32_1 = arith.constant 0 : i32
    return %c0_i32, %c0_i32_0 : i32, i32
  }
  func.func @transform_6(%arg0: i32, %arg1: memref<16xi32, #tpu.memory_space<smem>>, %arg2: memref<16xi32, #tpu.memory_space<smem>>) -> (i32, i32) {
    %c0_i32 = arith.constant 0 : i32
    %c0_i32_0 = arith.constant 0 : i32
    return %arg0, %c0_i32 : i32, i32
  }
}

</mosaic_0001>

<bundles_post_ra>
// kernel: tpu_custom_call.1
= control target key start
LH: loop header
LB: loop body
LE: loop exit
PB: predicated region body
PF: predicated region fallthrough
CT: control target
= control target key end

     0   :  { %s516_s27 = smov [#allocation6]   ;;  %s633_s0 = inlined_call_operand.hbm [shape: s32[16], index: 0, kind: input, shape index: {}]   ;;  %s634_s2 = inlined_call_operand.hbm [shape: f32[512,128], index: 2, kind: input, shape index: {}]   ;;  %s635_s3 = inlined_call_operand.hbm [shape: f32[64,128], index: 3, kind: input, shape index: {}]   ;;  %s636_s4 = inlined_call_operand.vmem [shape: f32[1,128], index: 4, kind: input, shape index: {}]   ;;  %s637_s5 = inlined_call_operand.vmem [shape: f32[1,128], index: 5, kind: input, shape index: {}]   ;;  %s638_s6 = inlined_call_operand.hbm [shape: bf16[128,128], index: 6, kind: input, shape index: {}]   ;;  %s639_s7 = inlined_call_operand.vmem [shape: f32[1,128], index: 7, kind: input, shape index: {}]   ;;  %s640_s8 = inlined_call_operand.hbm [shape: f32[16,128], index: 8, kind: output, shape index: {}]   ;;  %s641_s1 = inlined_call_operand.vmem [shape: s32[16], index: 1, kind: input, shape index: {}]  }
   0x1   :  { %14 = dma.hbm_to_smem %s633_s0, 16, %s516_s27, [#allocation5] }
   0x2   :  { %s15_s10 = sshll.u32 %s641_s1, 4  ;;  %s16_s10 = int_to_ptr.vmem [resolvable:$true] %s15_s10 }
   0x3   :  { %s394_s11 = scalar_lea.vmem %s16_s10, 16  ;;  %p399_p1 = scmp.lt.s32.totalorder %s16_s10, %s16_s10 }
   0x4   :  { %p395_p0 = scmp.ne.s32.totalorder %s16_s10, %s394_s11  ;;  %p400_p2 = scmp.lt.s32.totalorder %s394_s11, %s394_s11 }
   0x6   :  { %p401_p3 = por %p400_p2, %p399_p1 }
   0x8   :  { %p402_p4 = pnand %p401_p3, %p395_p0 }
   0xa   :  { %405 = shalt.err (!%p402_p4)  }
   0xb   :  { %s517_s12 = smov [#allocation7]  }
   0xc   :  { %18 = dma.vmem_to_smem %s16_s10, 16, %s517_s12, [#allocation5] }
   0xd   :  { %498 = dma.done.wait [#allocation5], 32 }
   0xe   :  { %499 = vsyncadd [#allocation5], 4294967264 }
   0xf   :  { %20 = sfence }
  0x10   :  { %21 = vsyncpa [#allocation9], 0 }
  0x11   :  { %22 = vsyncpa [#allocation10], 0  ;;  %s518_s0 = smov [#allocation8]  }
  0x12   :  { %s32_s13 = sshll.u32 %s518_s0, 4  ;;  %s33_s13 = int_to_ptr.vmem [resolvable:$true] %s32_s13 }
  0x13   :  { %s414_s14 = scalar_lea.vmem %s33_s13, 1024  ;;  %p419_p6 = scmp.lt.s32.totalorder %s33_s13, %s33_s13 }
  0x14   :  { %p415_p5 = scmp.ne.s32.totalorder %s33_s13, %s414_s14  ;;  %p420_p7 = scmp.lt.s32.totalorder %s414_s14, %s414_s14 }
  0x16   :  { %p421_p8 = por %p420_p7, %p419_p6 }
  0x18   :  { %p422_p9 = pnand %p421_p8, %p415_p5 }
  0x1a   :  { %425 = shalt.err (!%p422_p9)
}
  0x1b   :  { %s519_s1 = smov 64   ;;  %s520_s15 = smov 4  }
  0x1c   :  { %38 = dma.hbm_to_vmem [thread:$0]  %s638_s6, 1024, %s33_s13, [#allocation9], %s519_s1, %s519_s1, %s520_s15  }
  0x1d   :  { %500 = dma.done.wait [#allocation9], 1024  }
  0x1e   :  { %501 = vsyncadd [#allocation9], 4294966272  ;;  %s582_s18 = smov 0  }
  0x1f LB: > { %s53_s19 = sld [smem:[#allocation6 + %s510_s18]]  ;;  %s57_s21 = scalar_lea.vmem [#allocation2], %s510_s18  ;;  %s510_s18 = sphi %s582_s18, %s51_s18  }
  0x20   : > { %s589_s20 = sld [smem:[#allocation7 + %s510_s18]]  ;;  %s65_s22 = sshll.u32 %s57_s21, 4  ;;  %s66_s22 = int_to_ptr.vmem [resolvable:$true] %s65_s22 }
  0x21   : > { %s71_s6 = scalar_lea.vmem [#allocation3], %s510_s18  ;;  %s428_s10 = scalar_lea.hbm %s634_s2, 8192 }
  0x22   : > { %s80_s23 = sshll.u32 %s71_s6, 4  ;;  %s593_s23 = int_to_ptr.vmem [resolvable:$true] %s80_s23 }
  0x25   : > { %s304_s24 = sshll.u32 %s53_s19, 4 }
  0x26   : > { %s56_s27 = scalar_lea.hbm %s634_s2, %s304_s24  ;;  %s305_s28 = sshll.u32 %s589_s20, 4 }
  0x27   : > { %s426_s29 = scalar_lea.hbm %s56_s27, 16  ;;  %p429_p11 = scmp.lt.s32.totalorder %s56_s27, %s634_s2 }
  0x28   : > { %p427_p10 = scmp.ne.s32.totalorder %s56_s27, %s426_s29  ;;  %p430_p12 = scmp.lt.s32.totalorder %s428_s10, %s426_s29 }
  0x2a   : > { %p431_p13 = por %p430_p12, %p429_p11 }
  0x2c   : > { %p432_p0 = pnand %p431_p13, %p427_p10 }
  0x2e   : > { %435 = shalt.err (!%p432_p0)  }
  0x2f   : > { %s436_s0 = scalar_lea.vmem %s66_s22, 16  ;;  %s521_s13 = smov [#allocation2]  }
  0x30   : > { %p437_p1 = scmp.ne.s32.totalorder %s66_s22, %s436_s0  ;;  %s438_s14 = sshll.u32 %s521_s13, 4  ;;  %s439_s14 = int_to_ptr.vmem [resolvable:$false] %s438_s14 }
  0x31   : > { %s440_s1 = scalar_lea.vmem %s439_s14, 256  ;;  %p441_p2 = scmp.lt.s32.totalorder %s66_s22, %s439_s14 }
  0x32   : > { %p442_p3 = scmp.lt.s32.totalorder %s440_s1, %s436_s0 }
  0x34   : > { %p443_p4 = por %p442_p3, %p441_p2 }
  0x36   : > { %p444_p5 = pnand %p443_p4, %p437_p1 }
  0x38   : > { %447 = shalt.err (!%p444_p5)  }
  0x39   : > { %68 = dma.hbm_to_vmem [thread:$0]  %s56_s27, 16, %s66_s22, [#allocation4] }
  0x3a   : > { %s70_s17 = scalar_lea.hbm %s635_s3, %s305_s28  ;;  %s450_s6 = scalar_lea.hbm %s635_s3, 1024 }
  0x3b   : > { %s448_s19 = scalar_lea.hbm %s70_s17, 16  ;;  %p451_p7 = scmp.lt.s32.totalorder %s70_s17, %s635_s3 }
  0x3c   : > { %p449_p6 = scmp.ne.s32.totalorder %s70_s17, %s448_s19  ;;  %p452_p8 = scmp.lt.s32.totalorder %s450_s6, %s448_s19 }
  0x3e   : > { %p453_p9 = por %p452_p8, %p451_p7 }
  0x40   : > { %p454_p10 = pnand %p453_p9, %p449_p6 }
  0x42   : > { %457 = shalt.err (!%p454_p10)  }
  0x43   : > { %s458_s22 = scalar_lea.vmem %s593_s23, 16  ;;  %s522_s26 = smov [#allocation3]  }
  0x44   : > { %p459_p11 = scmp.ne.s32.totalorder %s593_s23, %s458_s22  ;;  %s460_s27 = sshll.u32 %s522_s26, 4  ;;  %s461_s27 = int_to_ptr.vmem [resolvable:$false] %s460_s27 }
  0x45   : > { %s462_s28 = scalar_lea.vmem %s461_s27, 256  ;;  %p463_p12 = scmp.lt.s32.totalorder %s593_s23, %s461_s27 }
  0x46   : > { %p464_p13 = scmp.lt.s32.totalorder %s462_s28, %s458_s22 }
  0x48   : > { %p465_p0 = por %p464_p13, %p463_p12 }
  0x4a   : > { %p466_p1 = pnand %p465_p0, %p459_p11 }
  0x4c   : > { %469 = shalt.err (!%p466_p1)  }
  0x4d   : > { %83 = dma.hbm_to_vmem [thread:$0]  %s70_s17, 16, %s593_s23, [#allocation4 + $0x1] }
  0x4e   : > { %s51_s18 = sadd.s32 1, %s510_s18  }
  0x4f   : > { %p48_p2 = scmp.ge.s32.totalorder %s51_s18, 16  }
  0x50   :  { %s512_s29 = smov (%p48_p2), 0  }
  0x51   :  { %50 = sbr.rel (!%p48_p2) target bundleno = 31 (0x1f), region = 69 }
  0x56 LB: > { %502 = dma.done.wait [#allocation4], 16  ;;  %s514_s29 = sphi %s512_s29, %s89_s29  }
  0x57   : > { %503 = vsyncadd [#allocation4], 4294967280 }
  0x58   : > { %504 = dma.done.wait [#allocation4 + $0x1], 16 }
  0x59   : > { %505 = vsyncadd [#allocation4 + $0x1], 4294967280  ;;  %s89_s29 = sadd.s32 1, %s514_s29  }
  0x5a   : > { %p86_p3 = scmp.ge.s32.totalorder %s89_s29, 16  }
  0x5b   :  { %v96_v0 = vld [vmem:[#allocation2] sm:$0xff] (%p86_p3)  ;;  %v98_v1 = vld [vmem:[#allocation3] sm:$0xff] (%p86_p3)  ;;  %v97_v2 = vld [vmem:[#allocation2 + $0x8] sm:$0xff] (%p86_p3)  ;;  %v523_v7 = vmov (%p86_p3), 0.0   ;;  %vm524_vm0 = vmmov (%p86_p3), 0   ;;  %s525_s10 = smov (%p86_p3), [#allocation11]  }
  0x5c   :  { %88 = sbr.rel (!%p86_p3) target bundleno = 86 (0x56), region = 80  ;;  %v100_v3 = vadd.f32 (%p86_p3), %v98_v1, %v96_v0  ;;  %v99_v4 = vld [vmem:[#allocation3 + $0x8] sm:$0xff] (%p86_p3)  ;;  %328 = vmatprep.subr.bf16.mxu0 (%p86_p3), %v523_v7  ;;  %v375_v8 = vld [vmem:[#allocation8 + $0x30] sm:$0xff] (%p86_p3)   ;;  %v376_v9 = vld [vmem:[#allocation8 + $0x28] sm:$0xff] (%p86_p3)   ;;  %344 = vmatprep.mubr.msk.bf16.mxu0 (%p86_p3), %vm524_vm0, %v523_v7 }
  0x5d   :  { %v101_v5 = vadd.f32 (%p86_p3), %v99_v4, %v97_v2  ;;  %v374_v6 = vld [vmem:[#allocation8 + $0x38] sm:$0xff] (%p86_p3)   ;;  %v377_v10 = vld [vmem:[#allocation8 + $0x20] sm:$0xff] (%p86_p3)   ;;  %v379_v20 = vld [vmem:[#allocation8 + $0x10] sm:$0xff] (%p86_p3)  }
  0x5e   :  { %102 = vadd.xlane.f32.xlu0 (%p86_p3), %v100_v3  ;;  %329 = vmatpush3.bf16.xpose.msra.mxu0 (%p86_p3), %v374_v6  ;;  %v378_v11 = vld [vmem:[#allocation8 + $0x18] sm:$0xff] (%p86_p3)   ;;  %v380_v21 = vld [vmem:[#allocation8 + $0x8] sm:$0xff] (%p86_p3)   ;;  %v381_v22 = vld [vmem:[#allocation8] sm:$0xff] (%p86_p3)  }
  0x5f   :  { %330 = vmatprep.subr.bf16.mxu0 (%p86_p3), %v523_v7  ;;  %v306_v31 = vld [vmem:[%s636_s4] ss:$0 sm:$0xff] (%p86_p3)  ;;  %s263_s4 = sshll.u32 (%p86_p3), %s525_s10, 4  ;;  %s264_s4 = int_to_ptr.vmem [resolvable:$true] %s263_s4 }
  0x60   :  { %v307_v35 = vld [vmem:[%s637_s5] ss:$0 sm:$0xff] (%p86_p3)  ;;  %s470_s5 = scalar_lea.vmem (%p86_p3), %s264_s4, 256  ;;  %p475_p5 = scmp.lt.s32.totalorder (%p86_p3), %s264_s4, %s264_s4 }
  0x61   :  { %v308_v40 = vld [vmem:[%s639_s7] ss:$0 sm:$0xff]  ;;  %p471_p4 = scmp.ne.s32.totalorder %s264_s4, %s470_s5  ;;  %p476_p6 = scmp.lt.s32.totalorder %s470_s5, %s470_s5 }
  0x62   :  { %104 = vadd.xlane.f32.xlu0 %v101_v5 }
  0x63   :  { %p477_p7 = por %p476_p6, %p475_p5 }
  0x65   :  { %p478_p8 = pnand %p477_p7, %p471_p4 }
  0x66   :  { %331 = vmatpush3.bf16.xpose.msra.mxu0 %v375_v8 }
  0x67   :  { %332 = vmatprep.subr.bf16.mxu0 %v523_v7 }
  0x6e   :  { %333 = vmatpush3.bf16.xpose.msra.mxu0 %v376_v9 }
  0x6f   :  { %334 = vmatprep.subr.bf16.mxu0 %v523_v7 }
  0x76   :  { %335 = vmatpush3.bf16.xpose.msra.mxu0 %v377_v10 }
  0x77   :  { %336 = vmatprep.subr.bf16.mxu0 %v523_v7 }
  0x7e   :  { %337 = vmatpush3.bf16.xpose.msra.mxu0 %v378_v11 }
  0x7f   :  { %338 = vmatprep.subr.bf16.mxu0 %v523_v7 }
  0x86   :  { %339 = vmatpush3.bf16.xpose.msra.mxu0 %v379_v20 }
  0x87   :  { %340 = vmatprep.subr.bf16.mxu0 %v523_v7 }
  0x8e   :  { %341 = vmatpush3.bf16.xpose.msra.mxu0 %v380_v21 }
  0x8f   :  { %342 = vmatprep.subr.bf16.mxu0 %v523_v7 }
  0x96   :  { %343 = vmatpush3.bf16.xpose.msra.mxu0 %v381_v22 }
  0xe7   :  { %v103_v12 = vpop.xlane.xlu0 %102 }
  0xe8   :  { %v107_v13 = vmul.f32 0.0078125, %v103_v12 }
  0xea   :  { %v109_v14 = vsub.f32 %v100_v3, %v107_v13 }
  0xeb   :  { %v105_v15 = vpop.xlane.xlu0 %104 }
  0xec   :  { %v108_v16 = vmul.f32 0.0078125, %v105_v15  ;;  %v111_v17 = vmul.f32 %v109_v14, %v109_v14 }
  0xee   :  { %v110_v18 = vsub.f32 %v101_v5, %v108_v16  ;;  %113 = vadd.xlane.f32.xlu1 %v111_v17 }
  0xf0   :  { %v112_v19 = vmul.f32 %v110_v18, %v110_v18 }
  0xf2   :  { %115 = vadd.xlane.f32.xlu1 %v112_v19 }
 0x177   :  { %v114_v23 = vpop.xlane.xlu1 %113 }
 0x178   :  { %v117_v24 = vmul.f32 0.0078125, %v114_v23 }
 0x17a   :  { %v119_v25 = vadd.f32 1e-05, %v117_v24 }
 0x17b   :  { %v116_v26 = vpop.xlane.xlu1 %115 }
 0x17c   :  { %382 = vrsqrt.f32 %v119_v25  ;;  %v118_v27 = vmul.f32 0.0078125, %v116_v26 }
 0x17e   :  { %v120_v28 = vadd.f32 1e-05, %v118_v27 }
 0x180   :  { %384 = vrsqrt.f32 %v120_v28 }
 0x189   :  { %v383_v29 = vpop.eup %382 }
 0x18a   :  { %v123_v30 = vmul.f32 %v383_v29, %v109_v14 }
 0x18c   :  { %v132_v34 = vmul.f32 %v306_v31, %v123_v30 }
 0x18d   :  { %v385_v32 = vpop.eup %384 }
 0x18e   :  { %v124_v33 = vmul.f32 %v385_v32, %v110_v18  ;;  %v141_v37 = vadd.f32 %v307_v35, %v132_v34 }
 0x190   :  { %v133_v36 = vmul.f32 %v306_v31, %v124_v33 }
 0x192   :  { %v142_v38 = vadd.f32 %v307_v35, %v133_v36 }
 0x194   :  { %v143_v39 = vpack.c.bf16 %v142_v38, %v141_v37 }
 0x196   :  { %345 = vmatmul.mubr.bf16.vlgmr.msra.gmra.mxu0 %v143_v39 }
 0x256   :  { %v249_v41 = vpop.f32.mrf.mxu0 }
 0x257   :  { %v250_v42 = vadd.f32 %v308_v40, %v249_v41 }
 0x258   :  { %v346_v43 = vpop.f32.mrf.mxu0 }
 0x259   :  { %256 = vst [vmem:[#allocation11] sm:$0xff] %v250_v42 }
 0x25a   :  { %v252_v44 = vpop.f32.mrf.mxu0 }
 0x25b   :  { %v253_v45 = vadd.f32 %v308_v40, %v252_v44 }
 0x25c   :  { %v347_v46 = vpop.f32.mrf.mxu0 }
 0x25d   :  { %257 = vst [vmem:[#allocation11 + $0x8] sm:$0xff] %v253_v45 }
 0x25e   :  { %481 = shalt.err (!%p478_p8)
}
 0x25f   :  { %s526_s11 = smov 128   ;;  %s527_s7 = smov 8  }
 0x260   :  { %269 = dma.vmem_to_hbm [thread:$0]  %s264_s4, 256, %s640_s8, [#allocation10], %s526_s11, %s526_s11, %s527_s7  }
 0x261   :  { %506 = dma.done.wait [#allocation10], 256  }
 0x262   :  { %507 = vsyncadd [#allocation10], 4294967040 }
 0x263   :  { %273 = vsyncpa [#allocation9], 1 }
 0x264   :  { %274 = vsyncpa [#allocation10], 1 }
 0x265   :  { %275 = vsyncmov [#allocation4] }
 0x268   :  { %s276_s13 = vpop.sfrf %275 }
 0x269   :  { %p317_p9 = scmp.ne.s32.totalorder %s276_s13, 0 }
 0x26b   :  { %280 = shalt.err (%p317_p9)  }
 0x26c   :  { %282 = vsyncmov [#allocation4 + $0x1] }
 0x26f   :  { %s283_s14 = vpop.sfrf %282 }
 0x270   :  { %p318_p10 = scmp.ne.s32.totalorder %s283_s14, 0 }
 0x272   :  { %287 = shalt.err (%p318_p10)  }

</bundles_post_ra>
